<compile_context>
chip_gen: v6e
topology: v6e:2x2x1
jax: 0.10.0
libtpu: 0.0.40
codegen_flags: <defaults>
</compile_context>

<pallas_src>
import jax
import jax.numpy as jnp
from jax import lax
from jax.experimental import pallas as pl
from jax.experimental.pallas import tpu as pltpu


def _round_up(x, m):
    return ((x + m - 1) // m) * m


def rnn_fc_kernel(ids_ref, proj_ref, whh_ref, wfc_ref, bfc_ref, out_ref):
    """ids: (S*Bp, 1) int32 time-major.  proj: (Vp, Dp) bf16 = pad(E @ Wih^T).
    whh: (Dp, Dp) bf16 = pad(Whh^T).  wfc: (Dp, Lp) bf16 = pad(Wfc^T / S).
    bfc: (1, Lp) f32.  out: (Bp, Lp) f32."""
    SB = ids_ref.shape[0]
    Vp, Dp = proj_ref.shape
    Bp = out_ref.shape[0]
    S = SB // Bp

    # Fused embedding gather + input projection for all timesteps in ONE MXU matmul:
    #   onehot(ids) @ (E @ Wih^T)  ->  (S*Bp, Dp), f32 accumulation.
    ids = ids_ref[...]                                                   # (S*Bp, 1)
    onehot = (ids == lax.broadcasted_iota(jnp.int32, (SB, Vp), 1)).astype(jnp.bfloat16)
    xw = jnp.dot(onehot, proj_ref[...], preferred_element_type=jnp.float32)

    whh = whh_ref[...]

    # Recurrence, fully unrolled (S static).  h0 == 0, so step 0 is just tanh(xw[0]).
    h = jnp.tanh(xw[0:Bp, :])                                            # (Bp, Dp) f32
    acc = h                                                              # running sum of h_t
    for t in range(1, S):
        x_t = xw[t * Bp:(t + 1) * Bp, :]                                 # static sublane-tile slice
        h = jnp.tanh(x_t + jnp.dot(h.astype(jnp.bfloat16), whh,
                                   preferred_element_type=jnp.float32))
        acc = acc + h

    # fc(mean over time): the 1/S scale is already folded into wfc.
    out_ref[...] = (jnp.dot(acc.astype(jnp.bfloat16), wfc_ref[...],
                            preferred_element_type=jnp.float32)
                    + bfc_ref[...])


def torch_model_forward(x_tokens, params):
    """x_tokens: int32 (B, S) token ids.  Returns y_pred float32 (B, sentence_length)."""
    emb = params["emb"].astype(jnp.float32)      # (V, D), row 0 == 0 (padding_idx=0)
    w_ih = params["w_ih"].astype(jnp.float32)    # (D, D)  PyTorch weight_ih_l0
    w_hh = params["w_hh"].astype(jnp.float32)    # (D, D)  PyTorch weight_hh_l0
    w_fc = params["w_fc"].astype(jnp.float32)    # (L, D)  PyTorch fc.weight
    b_fc = params["b_fc"].astype(jnp.float32)    # (L,)    PyTorch fc.bias

    B, S = x_tokens.shape
    V, D = emb.shape
    L = w_fc.shape[0]

    Bp = _round_up(B, 8)       # sublane-align batch
    Vp = _round_up(V, 128)     # lane-dense one-hot / sublane-aligned table
    Dp = _round_up(D, 128)     # lane-dense hidden dim
    Lp = _round_up(L, 128)     # lane-dense output dim

    # ---- weight prep (parameter-only, amortizable; math identical to the PyTorch forward) ----
    # Compose embedding with the input projection (gather-then-project == gather-from-projected),
    # fold the 1/S time-mean into the fc weight, zero-pad to lane-dense shapes, cast MXU operands
    # to bf16 (f32 accumulation happens in-kernel).
    proj = jnp.zeros((Vp, Dp), jnp.float32).at[:V, :D].set(emb @ w_ih.T).astype(jnp.bfloat16)
    whh_t = jnp.zeros((Dp, Dp), jnp.float32).at[:D, :D].set(w_hh.T).astype(jnp.bfloat16)
    wfc_t = jnp.zeros((Dp, Lp), jnp.float32).at[:D, :L].set(w_fc.T / S).astype(jnp.bfloat16)
    bfc = jnp.zeros((1, Lp), jnp.float32).at[0, :L].set(b_fc)

    # Token ids, time-major flat (row = t*Bp + b), batch padded with token 0 (the padding row).
    ids = jnp.zeros((S, Bp), jnp.int32).at[:, :B].set(x_tokens.T.astype(jnp.int32))
    ids = ids.reshape(S * Bp, 1)

    out = pl.pallas_call(
        rnn_fc_kernel,
        out_shape=jax.ShapeDtypeStruct((Bp, Lp), jnp.float32),
        in_specs=[pl.BlockSpec(memory_space=pltpu.MemorySpace.VMEM)] * 5,
        out_specs=pl.BlockSpec(memory_space=pltpu.MemorySpace.VMEM),
        compiler_params=pltpu.CompilerParams(vmem_limit_bytes=32 * 1024 * 1024),
    )(ids, proj, whh_t, wfc_t, bfc)

    return out[:B, :L]


def _reference_forward(x_tokens, params):
    """Plain-JAX f32 reference replicating the PyTorch forward (y=None path)."""
    e = jnp.take(params["emb"], x_tokens, axis=0)            # (B, S, D)

    def step(h, xt):
        h_new = jnp.tanh(xt @ params["w_ih"].T + h @ params["w_hh"].T)
        return h_new, h_new

    h0 = jnp.zeros((x_tokens.shape[0], params["emb"].shape[1]), jnp.float32)
    _, hs = lax.scan(step, h0, jnp.transpose(e, (1, 0, 2)))  # (S, B, D)
    mean_h = hs.mean(axis=0)
    return mean_h @ params["w_fc"].T + params["b_fc"]


if __name__ == "__main__":
    # Shapes implied by the module: x is (batch, sentence_length) token ids,
    # fc maps vector_dim -> sentence_length.
    vocab_size = 30
    vector_dim = 32
    sentence_length = 8
    batch = 8

    key = jax.random.PRNGKey(0)
    k_emb, k_ih, k_hh, k_fc, k_b, k_x = jax.random.split(key, 6)

    emb = jax.random.normal(k_emb, (vocab_size, vector_dim), jnp.float32) * 0.1
    emb = emb.at[0].set(0.0)  # nn.Embedding(padding_idx=0)
    w_ih = jax.random.normal(k_ih, (vector_dim, vector_dim), jnp.float32) * 0.1
    w_hh = jax.random.normal(k_hh, (vector_dim, vector_dim), jnp.float32) * 0.1
    w_fc = jax.random.normal(k_fc, (sentence_length, vector_dim), jnp.float32) * 0.1
    b_fc = jax.random.normal(k_b, (sentence_length,), jnp.float32) * 0.1

    params = dict(emb=emb, w_ih=w_ih, w_hh=w_hh, w_fc=w_fc, b_fc=b_fc)

    x = jax.random.randint(k_x, (batch, sentence_length), 0, vocab_size, dtype=jnp.int32)

    y_pred = torch_model_forward(x, params)
    jax.block_until_ready(y_pred)

    y_ref = _reference_forward(x, params)
    assert y_pred.shape == (batch, sentence_length)
    # bf16 MXU operands with f32 accumulation -> loosened tolerance vs. the pure-f32 reference.
    assert jnp.allclose(y_pred, y_ref, atol=1e-2, rtol=1e-2), "Pallas kernel mismatch vs reference"

    print("KERNEL_OK")
</pallas_src>

<mosaic_0001>
module attributes {stable_mosaic.version = 11 : i64} {
  func.func @rnn_fc_kernel(%arg0: memref<64x1xi32, #tpu.memory_space<vmem>>, %arg1: memref<128x128xbf16, #tpu.memory_space<vmem>>, %arg2: memref<128x128xbf16, #tpu.memory_space<vmem>>, %arg3: memref<128x128xbf16, #tpu.memory_space<vmem>>, %arg4: memref<1x128xf32, #tpu.memory_space<vmem>>, %arg5: memref<8x128xf32, #tpu.memory_space<vmem>>) attributes {dimension_semantics = [], scalar_prefetch = 0 : i64, scratch_operands = 0 : i64, tpu.core_type = #tpu.core_type<tc>} {
    %c0 = arith.constant 0 : index
    %c0_0 = arith.constant 0 : index
    %0 = vector.load %arg0[%c0, %c0_0] : memref<64x1xi32, #tpu.memory_space<vmem>>, vector<64x1xi32>
    %1 = tpu.iota {dimensions = array<i32: 1>} : vector<64x128xi32>
    %2 = vector.broadcast %0 : vector<64x1xi32> to vector<64x128xi32>
    %3 = arith.cmpi eq, %2, %1 : vector<64x128xi32>
    %4 = arith.extui %3 : vector<64x128xi1> to vector<64x128xi32>
    %5 = arith.sitofp %4 : vector<64x128xi32> to vector<64x128xf32>
    %6 = arith.truncf %5 : vector<64x128xf32> to vector<64x128xbf16>
    %c0_1 = arith.constant 0 : index
    %c0_2 = arith.constant 0 : index
    %7 = vector.load %arg1[%c0_1, %c0_2] : memref<128x128xbf16, #tpu.memory_space<vmem>>, vector<128x128xbf16>
    %cst = arith.constant dense<0.000000e+00> : vector<64x128xf32>
    %8 = tpu.matmul %6, %7, %cst {dimension_numbers = #tpu.dot_dimension_numbers<[1], [0], [0], [1], [0, 0, 1, 1], [], []>} : vector<64x128xbf16>, vector<128x128xbf16>, vector<64x128xf32> -> vector<64x128xf32>
    %c0_3 = arith.constant 0 : index
    %c0_4 = arith.constant 0 : index
    %9 = vector.load %arg2[%c0_3, %c0_4] : memref<128x128xbf16, #tpu.memory_space<vmem>>, vector<128x128xbf16>
    %10 = vector.extract_strided_slice %8 {offsets = [0, 0], sizes = [8, 128], strides = [1, 1]} : vector<64x128xf32> to vector<8x128xf32>
    %11 = math.tanh %10 : vector<8x128xf32>
    %12 = vector.extract_strided_slice %8 {offsets = [8, 0], sizes = [8, 128], strides = [1, 1]} : vector<64x128xf32> to vector<8x128xf32>
    %13 = arith.truncf %11 : vector<8x128xf32> to vector<8x128xbf16>
    %cst_5 = arith.constant dense<0.000000e+00> : vector<8x128xf32>
    %14 = tpu.matmul %13, %9, %cst_5 {dimension_numbers = #tpu.dot_dimension_numbers<[1], [0], [0], [1], [0, 0, 1, 1], [], []>} : vector<8x128xbf16>, vector<128x128xbf16>, vector<8x128xf32> -> vector<8x128xf32>
    %15 = arith.addf %12, %14 : vector<8x128xf32>
    %16 = math.tanh %15 : vector<8x128xf32>
    %17 = arith.addf %11, %16 : vector<8x128xf32>
    %18 = vector.extract_strided_slice %8 {offsets = [16, 0], sizes = [8, 128], strides = [1, 1]} : vector<64x128xf32> to vector<8x128xf32>
    %19 = arith.truncf %16 : vector<8x128xf32> to vector<8x128xbf16>
    %cst_6 = arith.constant dense<0.000000e+00> : vector<8x128xf32>
    %20 = tpu.matmul %19, %9, %cst_6 {dimension_numbers = #tpu.dot_dimension_numbers<[1], [0], [0], [1], [0, 0, 1, 1], [], []>} : vector<8x128xbf16>, vector<128x128xbf16>, vector<8x128xf32> -> vector<8x128xf32>
    %21 = arith.addf %18, %20 : vector<8x128xf32>
    %22 = math.tanh %21 : vector<8x128xf32>
    %23 = arith.addf %17, %22 : vector<8x128xf32>
    %24 = vector.extract_strided_slice %8 {offsets = [24, 0], sizes = [8, 128], strides = [1, 1]} : vector<64x128xf32> to vector<8x128xf32>
    %25 = arith.truncf %22 : vector<8x128xf32> to vector<8x128xbf16>
    %cst_7 = arith.constant dense<0.000000e+00> : vector<8x128xf32>
    %26 = tpu.matmul %25, %9, %cst_7 {dimension_numbers = #tpu.dot_dimension_numbers<[1], [0], [0], [1], [0, 0, 1, 1], [], []>} : vector<8x128xbf16>, vector<128x128xbf16>, vector<8x128xf32> -> vector<8x128xf32>
    %27 = arith.addf %24, %26 : vector<8x128xf32>
    %28 = math.tanh %27 : vector<8x128xf32>
    %29 = arith.addf %23, %28 : vector<8x128xf32>
    %30 = vector.extract_strided_slice %8 {offsets = [32, 0], sizes = [8, 128], strides = [1, 1]} : vector<64x128xf32> to vector<8x128xf32>
    %31 = arith.truncf %28 : vector<8x128xf32> to vector<8x128xbf16>
    %cst_8 = arith.constant dense<0.000000e+00> : vector<8x128xf32>
    %32 = tpu.matmul %31, %9, %cst_8 {dimension_numbers = #tpu.dot_dimension_numbers<[1], [0], [0], [1], [0, 0, 1, 1], [], []>} : vector<8x128xbf16>, vector<128x128xbf16>, vector<8x128xf32> -> vector<8x128xf32>
    %33 = arith.addf %30, %32 : vector<8x128xf32>
    %34 = math.tanh %33 : vector<8x128xf32>
    %35 = arith.addf %29, %34 : vector<8x128xf32>
    %36 = vector.extract_strided_slice %8 {offsets = [40, 0], sizes = [8, 128], strides = [1, 1]} : vector<64x128xf32> to vector<8x128xf32>
    %37 = arith.truncf %34 : vector<8x128xf32> to vector<8x128xbf16>
    %cst_9 = arith.constant dense<0.000000e+00> : vector<8x128xf32>
    %38 = tpu.matmul %37, %9, %cst_9 {dimension_numbers = #tpu.dot_dimension_numbers<[1], [0], [0], [1], [0, 0, 1, 1], [], []>} : vector<8x128xbf16>, vector<128x128xbf16>, vector<8x128xf32> -> vector<8x128xf32>
    %39 = arith.addf %36, %38 : vector<8x128xf32>
    %40 = math.tanh %39 : vector<8x128xf32>
    %41 = arith.addf %35, %40 : vector<8x128xf32>
    %42 = vector.extract_strided_slice %8 {offsets = [48, 0], sizes = [8, 128], strides = [1, 1]} : vector<64x128xf32> to vector<8x128xf32>
    %43 = arith.truncf %40 : vector<8x128xf32> to vector<8x128xbf16>
    %cst_10 = arith.constant dense<0.000000e+00> : vector<8x128xf32>
    %44 = tpu.matmul %43, %9, %cst_10 {dimension_numbers = #tpu.dot_dimension_numbers<[1], [0], [0], [1], [0, 0, 1, 1], [], []>} : vector<8x128xbf16>, vector<128x128xbf16>, vector<8x128xf32> -> vector<8x128xf32>
    %45 = arith.addf %42, %44 : vector<8x128xf32>
    %46 = math.tanh %45 : vector<8x128xf32>
    %47 = arith.addf %41, %46 : vector<8x128xf32>
    %48 = vector.extract_strided_slice %8 {offsets = [56, 0], sizes = [8, 128], strides = [1, 1]} : vector<64x128xf32> to vector<8x128xf32>
    %49 = arith.truncf %46 : vector<8x128xf32> to vector<8x128xbf16>
    %cst_11 = arith.constant dense<0.000000e+00> : vector<8x128xf32>
    %50 = tpu.matmul %49, %9, %cst_11 {dimension_numbers = #tpu.dot_dimension_numbers<[1], [0], [0], [1], [0, 0, 1, 1], [], []>} : vector<8x128xbf16>, vector<128x128xbf16>, vector<8x128xf32> -> vector<8x128xf32>
    %51 = arith.addf %48, %50 : vector<8x128xf32>
    %52 = math.tanh %51 : vector<8x128xf32>
    %53 = arith.addf %47, %52 : vector<8x128xf32>
    %54 = arith.truncf %53 : vector<8x128xf32> to vector<8x128xbf16>
    %c0_12 = arith.constant 0 : index
    %c0_13 = arith.constant 0 : index
    %55 = vector.load %arg3[%c0_12, %c0_13] : memref<128x128xbf16, #tpu.memory_space<vmem>>, vector<128x128xbf16>
    %cst_14 = arith.constant dense<0.000000e+00> : vector<8x128xf32>
    %56 = tpu.matmul %54, %55, %cst_14 {dimension_numbers = #tpu.dot_dimension_numbers<[1], [0], [0], [1], [0, 0, 1, 1], [], []>} : vector<8x128xbf16>, vector<128x128xbf16>, vector<8x128xf32> -> vector<8x128xf32>
    %c0_15 = arith.constant 0 : index
    %c0_16 = arith.constant 0 : index
    %57 = vector.load %arg4[%c0_15, %c0_16] : memref<1x128xf32, #tpu.memory_space<vmem>>, vector<1x128xf32>
    %58 = vector.broadcast %57 : vector<1x128xf32> to vector<8x128xf32>
    %59 = arith.addf %56, %58 : vector<8x128xf32>
    %c0_17 = arith.constant 0 : index
    %c0_18 = arith.constant 0 : index
    %60 = vector.load %arg5[%c0_17, %c0_18] : memref<8x128xf32, #tpu.memory_space<vmem>>, vector<8x128xf32>
    tpu.vector_store %arg5[%c0_17, %c0_18], %59 {strides = array<i32>} : memref<8x128xf32, #tpu.memory_space<vmem>>, vector<8x128xf32>,
    return
  }
}

</mosaic_0001>

<bundles_post_ra>
// kernel: tpu_custom_call.1
= control target key start
LH: loop header
LB: loop body
LE: loop exit
PB: predicated region body
PF: predicated region fallthrough
CT: control target
= control target key end

     0   :  { %10 = vsyncpa [#allocation3], 0  ;;  %s1429_s0 = inlined_call_operand.vmem [shape: s32[64,1], index: 0, kind: input, shape index: {}]   ;;  %s1430_s1 = inlined_call_operand.vmem [shape: bf16[128,128], index: 1, kind: input, shape index: {}]   ;;  %s1431_s2 = inlined_call_operand.hbm [shape: bf16[128,128], index: 2, kind: input, shape index: {}]   ;;  %s1432_s3 = inlined_call_operand.hbm [shape: bf16[128,128], index: 3, kind: input, shape index: {}]   ;;  %s1433_s4 = inlined_call_operand.vmem [shape: f32[1,128], index: 4, kind: input, shape index: {}]   ;;  %s1434_s5 = inlined_call_operand.hbm [shape: f32[8,128], index: 5, kind: output, shape index: {}]  }
   0x1   :  { %11 = vsyncpa [#allocation6], 0 }
   0x2   :  { %12 = vsyncpa [#allocation4], 0  ;;  %s1169_s18 = smov [#allocation2]  }
   0x3   :  { %s22_s19 = sshll.u32 %s1169_s18, 4  ;;  %s23_s19 = int_to_ptr.vmem [resolvable:$true] %s22_s19 }
   0x4   :  { %s1111_s20 = scalar_lea.vmem %s23_s19, 1024  ;;  %p1116_p1 = scmp.lt.s32.totalorder %s23_s19, %s23_s19 }
   0x5   :  { %p1112_p0 = scmp.ne.s32.totalorder %s23_s19, %s1111_s20  ;;  %p1117_p2 = scmp.lt.s32.totalorder %s1111_s20, %s1111_s20 }
   0x7   :  { %p1118_p3 = por %p1117_p2, %p1116_p1 }
   0x9   :  { %p1119_p4 = pnand %p1118_p3, %p1112_p0 }
   0xb   :  { %1122 = shalt.err (!%p1119_p4)
}
   0xc   :  { %s1170_s21 = smov 64   ;;  %s1171_s22 = smov 4  }
   0xd   :  { %28 = dma.hbm_to_vmem [thread:$0]  %s1431_s2, 1024, %s23_s19, [#allocation3], %s1170_s21, %s1170_s21, %s1171_s22  }
   0xe   :  { %s1172_s25 = smov [#allocation5]  }
   0xf   :  { %s34_s26 = sshll.u32 %s1172_s25, 4  ;;  %s35_s26 = int_to_ptr.vmem [resolvable:$true] %s34_s26 }
  0x10   :  { %s1131_s27 = scalar_lea.vmem %s35_s26, 1024  ;;  %p1136_p6 = scmp.lt.s32.totalorder %s35_s26, %s35_s26 }
  0x11   :  { %p1132_p5 = scmp.ne.s32.totalorder %s35_s26, %s1131_s27  ;;  %p1137_p7 = scmp.lt.s32.totalorder %s1131_s27, %s1131_s27 }
  0x13   :  { %p1138_p8 = por %p1137_p7, %p1136_p6 }
  0x15   :  { %p1139_p9 = pnand %p1138_p8, %p1132_p5 }
  0x17   :  { %1142 = shalt.err (!%p1139_p9)
}
  0x18   :  { %40 = dma.hbm_to_vmem [thread:$0]  %s1432_s3, 1024, %s35_s26, [#allocation6], %s1170_s21, %s1170_s21, %s1171_s22  }
  0x19   :  { %1163 = dma.done.wait [#allocation3], 1024  }
  0x1a   :  { %1164 = vsyncadd [#allocation3], 4294966272 }
  0x1b   :  { %1165 = dma.done.wait [#allocation6], 1024  }
  0x1c   :  { %1166 = vsyncadd [#allocation6], 4294966272  ;;  %v1173_v0 = vmov 0   ;;  %v52_v1 = vld [vmem:[%s1429_s0 + $0x10] sm:$0xff]  ;;  %v50_v2 = vld [vmem:[%s1429_s0] sm:$0xff]  ;;  %v1174_v16 = vmov 0.0   ;;  %v58_v21 = vlaneseq }
  0x1d   :  { %1062 = vset.pattern.permute.xlu1 %v1173_v0  ;;  %1061 = vset.pattern.permute.xlu0 %v1173_v0  ;;  %v53_v3 = vld [vmem:[%s1429_s0 + $0x18] sm:$0xff]  ;;  %v51_v4 = vld [vmem:[%s1429_s0 + $0x8] sm:$0xff]  ;;  %v1064_v6 = vld [vmem:[%s1430_s1 + $0x30] sm:$0xff]   ;;  %v1175_v27 = vmov 1.0|1.0   ;;  %vm1176_vm12 = vmmov 0  }
  0x1e   :  { %67 = vperm.xlu1 %1062, %v52_v1   ;;  %61 = vperm.xlu0 %1061, %v50_v2   ;;  %v1063_v5 = vld [vmem:[%s1430_s1 + $0x38] sm:$0xff]   ;;  %v55_v7 = vld [vmem:[%s1429_s0 + $0x28] sm:$0xff]  ;;  %v54_v8 = vld [vmem:[%s1429_s0 + $0x20] sm:$0xff]  ;;  %v59_v24 = vand.u32 127, %v58_v21  ;;  %s1177_s9 = smov [#allocation7]  }
  0x1f   :  { %868 = vmatprep.subr.bf16.mxu0 %v1063_v5  ;;  %v1065_v9 = vld [vmem:[%s1430_s1 + $0x28] sm:$0xff]   ;;  %v57_v10 = vld [vmem:[%s1429_s0 + $0x38] sm:$0xff]  ;;  %v56_v11 = vld [vmem:[%s1429_s0 + $0x30] sm:$0xff]  ;;  %892 = vmatprep.subr.bf16.mxu1 %v1174_v16  ;;  %s733_s3 = sshll.u32 %s1177_s9, 4  ;;  %s734_s3 = int_to_ptr.vmem [resolvable:$true] %s733_s3 }
  0x20   :  { %869 = vmatpush3.bf16.msra.mxu0 %v1063_v5  ;;  %v1066_v12 = vld [vmem:[%s1430_s1 + $0x20] sm:$0xff]   ;;  %v1250_v13 = vld [vmem:[#allocation2 + $0x38] sm:$0xff]   ;;  %v1252_v14 = vld [vmem:[#allocation2 + $0x30] sm:$0xff]   ;;  %908 = vmatprep.mubr.msk.bf16.mxu1 %vm1176_vm12, %v1174_v16  ;;  %s1143_s10 = scalar_lea.vmem %s734_s3, 128  ;;  %p1148_p11 = scmp.lt.s32.totalorder %s734_s3, %s734_s3 }
  0x21   :  { %870 = vmatprep.subr.bf16.mxu0 %v1064_v6  ;;  %v1067_v15 = vld [vmem:[%s1430_s1 + $0x18] sm:$0xff]   ;;  %893 = vmatpush3.bf16.msra.mxu1 %v1250_v13  ;;  %v1260_v17 = vld [vmem:[#allocation2 + $0x28] sm:$0xff]   ;;  %v1068_v18 = vld [vmem:[%s1430_s1 + $0x10] sm:$0xff]   ;;  %p1144_p10 = scmp.ne.s32.totalorder %s734_s3, %s1143_s10  ;;  %p1149_p12 = scmp.lt.s32.totalorder %s1143_s10, %s1143_s10 }
  0x22   :  { %70 = vperm.xlu1 %1062, %v53_v3   ;;  %64 = vperm.xlu0 %1061, %v51_v4   ;;  %v1069_v19 = vld [vmem:[%s1430_s1 + $0x8] sm:$0xff]   ;;  %v1070_v20 = vld [vmem:[%s1430_s1] sm:$0xff]   ;;  %v1288_v33 = vld [vmem:[#allocation2 + $0x18] sm:$0xff]  }
  0x23   :  { %894 = vmatprep.subr.bf16.mxu1 %v1174_v16  ;;  %v1282_v32 = vld [vmem:[#allocation2 + $0x20] sm:$0xff]   ;;  %v1294_v34 = vld [vmem:[#allocation2 + $0x10] sm:$0xff]   ;;  %v1300_v35 = vld [vmem:[#allocation2 + $0x8] sm:$0xff]   ;;  %p1150_p13 = por %p1149_p12, %p1148_p11 }
  0x24   :  { %871 = vmatpush3.bf16.msra.mxu0 %v1064_v6  ;;  %v1306_v36 = vld [vmem:[#allocation2] sm:$0xff]  }
  0x25   :  { %872 = vmatprep.subr.bf16.mxu0 %v1065_v9  ;;  %895 = vmatpush3.bf16.msra.mxu1 %v1252_v14  ;;  %p1151_p0 = pnand %p1150_p13, %p1144_p10 }
  0x26   :  { %76 = vperm.xlu1 %1062, %v55_v7   ;;  %73 = vperm.xlu0 %1061, %v54_v8  }
  0x27   :  { %896 = vmatprep.subr.bf16.mxu1 %v1174_v16 }
  0x28   :  { %873 = vmatpush3.bf16.msra.mxu0 %v1065_v9 }
  0x29   :  { %874 = vmatprep.subr.bf16.mxu0 %v1066_v12  ;;  %897 = vmatpush3.bf16.msra.mxu1 %v1260_v17 }
  0x2a   :  { %82 = vperm.xlu1 %1062, %v57_v10   ;;  %79 = vperm.xlu0 %1061, %v56_v11  }
  0x2b   :  { %898 = vmatprep.subr.bf16.mxu1 %v1174_v16 }
  0x2c   :  { %875 = vmatpush3.bf16.msra.mxu0 %v1066_v12 }
  0x2d   :  { %876 = vmatprep.subr.bf16.mxu0 %v1067_v15  ;;  %899 = vmatpush3.bf16.msra.mxu1 %v1282_v32 }
  0x2e   :  { %900 = vmatprep.subr.bf16.mxu1 %v1174_v16 }
  0x30   :  { %877 = vmatpush3.bf16.msra.mxu0 %v1067_v15 }
  0x31   :  { %878 = vmatprep.subr.bf16.mxu0 %v1068_v18  ;;  %901 = vmatpush3.bf16.msra.mxu1 %v1288_v33 }
  0x32   :  { %902 = vmatprep.subr.bf16.mxu1 %v1174_v16 }
  0x34   :  { %879 = vmatpush3.bf16.msra.mxu0 %v1068_v18 }
  0x35   :  { %880 = vmatprep.subr.bf16.mxu0 %v1069_v19  ;;  %903 = vmatpush3.bf16.msra.mxu1 %v1294_v34 }
  0x36   :  { %904 = vmatprep.subr.bf16.mxu1 %v1174_v16 }
  0x38   :  { %881 = vmatpush3.bf16.msra.mxu0 %v1069_v19 }
  0x39   :  { %882 = vmatprep.subr.bf16.mxu0 %v1070_v20  ;;  %905 = vmatpush3.bf16.msra.mxu1 %v1300_v35 }
  0x3a   :  { %906 = vmatprep.subr.bf16.mxu1 %v1174_v16 }
  0x3c   :  { %883 = vmatpush3.bf16.msra.mxu0 %v1070_v20 }
  0x3d   :  { %912 = vmatprep.subr.bf16.mxu0 %v1174_v16  ;;  %907 = vmatpush3.bf16.msra.mxu1 %v1306_v36 }
  0x3e   :  { %932 = vmatprep.subr.bf16.mxu1 %v1174_v16 }
  0x99   :  { %v68_v22 = vpop.permute.xlu1 %67  ;;  %v62_v23 = vpop.permute.xlu0 %61 }
  0x9a   :  { %vm86_vm0 = vcmp.eq.s32.totalorder %v68_v22, %v59_v24  ;;  %vm84_vm3 = vcmp.eq.s32.totalorder %v62_v23, %v59_v24 }
  0x9d   :  { %v71_v25 = vpop.permute.xlu1 %70  ;;  %v65_v26 = vpop.permute.xlu0 %64 }
  0x9e   :  { %vm87_vm1 = vcmp.eq.s32.totalorder %v71_v25, %v59_v24  ;;  %vm85_vm2 = vcmp.eq.s32.totalorder %v65_v26, %v59_v24  ;;  %v1080_v25 = vld [vmem:[#allocation5 + $0x30] sm:$0xff]   ;;  %v1081_v26 = vld [vmem:[#allocation5 + $0x28] sm:$0xff]  }
  0x9f   :  { %vm761_vm4 = vmpackc.low %vm87_vm1, %vm86_vm0 }
  0xa0   :  { %vm759_vm5 = vmpackc.low %vm85_vm2, %vm84_vm3 }
  0xa1   :  { %884 = vmatprep.mubr.msk.bf16.mxu0 %vm759_vm5, %v1175_v27  ;;  %v77_v28 = vpop.permute.xlu1 %76  ;;  %v74_v29 = vpop.permute.xlu0 %73 }
  0xa2   :  { %vm89_vm6 = vcmp.eq.s32.totalorder %v77_v28, %v59_v24  ;;  %885 = vmatmul.mubr.msk.bf16.vlgmr.msra.gmra.mxu0 %vm761_vm4, %v1175_v27  ;;  %vm88_vm7 = vcmp.eq.s32.totalorder %v74_v29, %v59_v24 }
  0xa3   :  { %vm763_vm8 = vmpackc.low %vm89_vm6, %vm88_vm7  ;;  %913 = vmatpush3.bf16.msra.mxu0 %v1250_v13 }
  0xa4   :  { %888 = vmatprep.mubr.msk.bf16.mxu0 %vm763_vm8, %v1175_v27  ;;  %914 = vmatprep.subr.bf16.mxu0 %v1174_v16 }
  0xa5   :  { %v83_v30 = vpop.permute.xlu1 %82  ;;  %v80_v31 = vpop.permute.xlu0 %79 }
  0xa6   :  { %vm91_vm9 = vcmp.eq.s32.totalorder %v83_v30, %v59_v24  ;;  %vm90_vm10 = vcmp.eq.s32.totalorder %v80_v31, %v59_v24  ;;  %v1079_v24 = vld [vmem:[#allocation5 + $0x38] sm:$0xff]  }
  0xa7   :  { %vm765_vm11 = vmpackc.low %vm91_vm9, %vm90_vm10  ;;  %915 = vmatpush3.bf16.msra.mxu0 %v1252_v14 }
  0xa8   :  { %916 = vmatprep.subr.bf16.mxu0 %v1174_v16 }
  0xaa   :  { %889 = vmatmul.mubr.msk.bf16.gmra.mxu0 %vm765_vm11, %v1175_v27 }
  0xab   :  { %917 = vmatpush3.bf16.msra.mxu0 %v1260_v17  ;;  %928 = vmatprep.mubr.msk.bf16.mxu0 %vm1176_vm12, %v1174_v16 }
  0xac   :  { %918 = vmatprep.subr.bf16.mxu0 %v1174_v16 }
  0xaf   :  { %919 = vmatpush3.bf16.msra.mxu0 %v1282_v32 }
  0xb0   :  { %920 = vmatprep.subr.bf16.mxu0 %v1174_v16 }
  0xb3   :  { %921 = vmatpush3.bf16.msra.mxu0 %v1288_v33 }
  0xb4   :  { %922 = vmatprep.subr.bf16.mxu0 %v1174_v16 }
  0xb7   :  { %923 = vmatpush3.bf16.msra.mxu0 %v1294_v34 }
  0xb8   :  { %924 = vmatprep.subr.bf16.mxu0 %v1174_v16 }
  0xbb   :  { %925 = vmatpush3.bf16.msra.mxu0 %v1300_v35 }
  0xbc   :  { %926 = vmatprep.subr.bf16.mxu0 %v1174_v16 }
  0xbf   :  { %927 = vmatpush3.bf16.msra.mxu0 %v1306_v36 }
  0xc0   :  { %952 = vmatprep.subr.bf16.mxu0 %v1174_v16 }
 0x162   :  { %v886_v37 = vpop.f32.mrf.mxu0 }
 0x164   :  { %v210_v38 = vpop.f32.mrf.mxu0 }
 0x165   :  { %1087 = vtanh.f32 %v210_v38  ;;  %v1085_v38 = vld [vmem:[#allocation5 + $0x8] sm:$0xff]  }
 0x166   :  { %v887_v41 = vpop.f32.mrf.mxu0 }
 0x168   :  { %v213_v42 = vpop.f32.mrf.mxu0 }
 0x16a   :  { %v1352_v50 = vpop.f32.mrf.mxu0 }
 0x16c   :  { %v226_v51 = vpop.f32.mrf.mxu0 }
 0x16e   :  { %v1354_v52 = vpop.f32.mrf.mxu0 }
 0x170   :  { %v1356_v53 = vpop.f32.mrf.mxu0 }
 0x172   :  { %v1088_v39 = vpop.eup %1087 }
 0x173   :  { %v258_v40 = vpack.c.bf16 %v1088_v39, %v1088_v39 }
 0x175   :  { %909 = vmatmul.mubr.bf16.vlgmr.msra.gmra.mxu1 %v258_v40 }
 0x176   :  { %933 = vmatpush3.bf16.msra.mxu1 %v1250_v13  ;;  %948 = vmatprep.mubr.msk.bf16.mxu1 %vm1176_vm12, %v1174_v16 }
 0x177   :  { %934 = vmatprep.subr.bf16.mxu1 %v1174_v16 }
 0x17a   :  { %935 = vmatpush3.bf16.msra.mxu1 %v1252_v14 }
 0x17b   :  { %936 = vmatprep.subr.bf16.mxu1 %v1174_v16 }
 0x17e   :  { %937 = vmatpush3.bf16.msra.mxu1 %v1260_v17 }
 0x17f   :  { %938 = vmatprep.subr.bf16.mxu1 %v1174_v16 }
 0x182   :  { %939 = vmatpush3.bf16.msra.mxu1 %v1282_v32 }
 0x183   :  { %940 = vmatprep.subr.bf16.mxu1 %v1174_v16 }
 0x186   :  { %941 = vmatpush3.bf16.msra.mxu1 %v1288_v33 }
 0x187   :  { %942 = vmatprep.subr.bf16.mxu1 %v1174_v16 }
 0x18a   :  { %943 = vmatpush3.bf16.msra.mxu1 %v1294_v34 }
 0x18b   :  { %944 = vmatprep.subr.bf16.mxu1 %v1174_v16 }
 0x18e   :  { %945 = vmatpush3.bf16.msra.mxu1 %v1300_v35 }
 0x18f   :  { %946 = vmatprep.subr.bf16.mxu1 %v1174_v16 }
 0x192   :  { %947 = vmatpush3.bf16.msra.mxu1 %v1306_v36 }
 0x193   :  { %972 = vmatprep.subr.bf16.mxu1 %v1174_v16 }
 0x235   :  { %v341_v43 = vpop.f32.mrf.mxu1 }
 0x236   :  { %v347_v44 = vadd.f32 %v341_v43, %v213_v42 }
 0x237   :  { %v910_v45 = vpop.f32.mrf.mxu1 }
 0x238   :  { %1089 = vtanh.f32 %v347_v44 }
 0x239   :  { %v344_v46 = vpop.f32.mrf.mxu1 }
 0x23b   :  { %v911_v47 = vpop.f32.mrf.mxu1 }
 0x245   :  { %v1090_v48 = vpop.eup %1089 }
 0x246   :  { %v350_v49 = vpack.c.bf16 %v1090_v48, %v1090_v48  ;;  %v349_v59 = vadd.f32 %v1090_v48, %v1088_v39  ;;  %v1086_v39 = vld [vmem:[#allocation5] sm:$0xff]  }
 0x247   :  { %v775_v48 = vld [vmem:[%s1433_s4] ss:$0 sm:$0xff] }
 0x248   :  { %929 = vmatmul.mubr.bf16.vlgmr.msra.gmra.mxu0 %v350_v49 }
 0x249   :  { %953 = vmatpush3.bf16.msra.mxu0 %v1250_v13  ;;  %968 = vmatprep.mubr.msk.bf16.mxu0 %vm1176_vm12, %v1174_v16 }
 0x24a   :  { %954 = vmatprep.subr.bf16.mxu0 %v1174_v16 }
 0x24d   :  { %955 = vmatpush3.bf16.msra.mxu0 %v1252_v14 }
 0x24e   :  { %956 = vmatprep.subr.bf16.mxu0 %v1174_v16 }
 0x251   :  { %957 = vmatpush3.bf16.msra.mxu0 %v1260_v17 }
 0x252   :  { %958 = vmatprep.subr.bf16.mxu0 %v1174_v16 }
 0x255   :  { %959 = vmatpush3.bf16.msra.mxu0 %v1282_v32 }
 0x256   :  { %960 = vmatprep.subr.bf16.mxu0 %v1174_v16 }
 0x259   :  { %961 = vmatpush3.bf16.msra.mxu0 %v1288_v33 }
 0x25a   :  { %962 = vmatprep.subr.bf16.mxu0 %v1174_v16 }
 0x25d   :  { %963 = vmatpush3.bf16.msra.mxu0 %v1294_v34 }
 0x25e   :  { %964 = vmatprep.subr.bf16.mxu0 %v1174_v16 }
 0x261   :  { %965 = vmatpush3.bf16.msra.mxu0 %v1300_v35 }
 0x262   :  { %966 = vmatprep.subr.bf16.mxu0 %v1174_v16 }
 0x265   :  { %967 = vmatpush3.bf16.msra.mxu0 %v1306_v36 }
 0x266   :  { %992 = vmatprep.subr.bf16.mxu0 %v1174_v16 }
 0x308   :  { %v385_v54 = vpop.f32.mrf.mxu0 }
 0x309   :  { %v391_v55 = vadd.f32 %v886_v37, %v385_v54  ;;  %v1084_v37 = vld [vmem:[#allocation5 + $0x10] sm:$0xff]  }
 0x30a   :  { %v930_v56 = vpop.f32.mrf.mxu0 }
 0x30b   :  { %1091 = vtanh.f32 %v391_v55 }
 0x30c   :  { %v388_v57 = vpop.f32.mrf.mxu0 }
 0x30e   :  { %v931_v58 = vpop.f32.mrf.mxu0 }
 0x318   :  { %v1092_v60 = vpop.eup %1091 }
 0x319   :  { %v393_v61 = vadd.f32 %v1092_v60, %v349_v59  ;;  %v394_v62 = vpack.c.bf16 %v1092_v60, %v1092_v60 }
 0x31b   :  { %949 = vmatmul.mubr.bf16.vlgmr.msra.gmra.mxu1 %v394_v62 }
 0x31c   :  { %973 = vmatpush3.bf16.msra.mxu1 %v1250_v13  ;;  %988 = vmatprep.mubr.msk.bf16.mxu1 %vm1176_vm12, %v1174_v16 }
 0x31d   :  { %974 = vmatprep.subr.bf16.mxu1 %v1174_v16 }
 0x320   :  { %975 = vmatpush3.bf16.msra.mxu1 %v1252_v14 }
 0x321   :  { %976 = vmatprep.subr.bf16.mxu1 %v1174_v16 }
 0x324   :  { %977 = vmatpush3.bf16.msra.mxu1 %v1260_v17 }
 0x325   :  { %978 = vmatprep.subr.bf16.mxu1 %v1174_v16 }
 0x328   :  { %979 = vmatpush3.bf16.msra.mxu1 %v1282_v32 }
 0x329   :  { %980 = vmatprep.subr.bf16.mxu1 %v1174_v16 }
 0x32c   :  { %981 = vmatpush3.bf16.msra.mxu1 %v1288_v33 }
 0x32d   :  { %982 = vmatprep.subr.bf16.mxu1 %v1174_v16 }
 0x330   :  { %983 = vmatpush3.bf16.msra.mxu1 %v1294_v34 }
 0x331   :  { %984 = vmatprep.subr.bf16.mxu1 %v1174_v16 }
 0x334   :  { %985 = vmatpush3.bf16.msra.mxu1 %v1300_v35 }
 0x335   :  { %986 = vmatprep.subr.bf16.mxu1 %v1174_v16 }
 0x338   :  { %987 = vmatpush3.bf16.msra.mxu1 %v1306_v36 }
 0x339   :  { %1012 = vmatprep.subr.bf16.mxu1 %v1174_v16 }
 0x3db   :  { %v429_v63 = vpop.f32.mrf.mxu1 }
 0x3dc   :  { %v435_v0 = vadd.f32 %v887_v41, %v429_v63 }
 0x3dd   :  { %v950_v1 = vpop.f32.mrf.mxu1 }
 0x3de   :  { %1093 = vtanh.f32 %v435_v0 }
 0x3df   :  { %v432_v2 = vpop.f32.mrf.mxu1 }
 0x3e1   :  { %v951_v3 = vpop.f32.mrf.mxu1 }
 0x3eb   :  { %v1094_v4 = vpop.eup %1093 }
 0x3ec   :  { %v437_v5 = vadd.f32 %v1094_v4, %v393_v61  ;;  %v438_v6 = vpack.c.bf16 %v1094_v4, %v1094_v4 }
 0x3ee   :  { %969 = vmatmul.mubr.bf16.vlgmr.msra.gmra.mxu0 %v438_v6 }
 0x3ef   :  { %993 = vmatpush3.bf16.msra.mxu0 %v1250_v13  ;;  %1008 = vmatprep.mubr.msk.bf16.mxu0 %vm1176_vm12, %v1174_v16 }
 0x3f0   :  { %994 = vmatprep.subr.bf16.mxu0 %v1174_v16 }
 0x3f3   :  { %995 = vmatpush3.bf16.msra.mxu0 %v1252_v14 }
 0x3f4   :  { %996 = vmatprep.subr.bf16.mxu0 %v1174_v16 }
 0x3f7   :  { %997 = vmatpush3.bf16.msra.mxu0 %v1260_v17 }
 0x3f8   :  { %998 = vmatprep.subr.bf16.mxu0 %v1174_v16 }
 0x3fb   :  { %999 = vmatpush3.bf16.msra.mxu0 %v1282_v32 }
 0x3fc   :  { %1000 = vmatprep.subr.bf16.mxu0 %v1174_v16 }
 0x3ff   :  { %1001 = vmatpush3.bf16.msra.mxu0 %v1288_v33 }
 0x400   :  { %1002 = vmatprep.subr.bf16.mxu0 %v1174_v16 }
 0x403   :  { %1003 = vmatpush3.bf16.msra.mxu0 %v1294_v34 }
 0x404   :  { %1004 = vmatprep.subr.bf16.mxu0 %v1174_v16 }
 0x407   :  { %1005 = vmatpush3.bf16.msra.mxu0 %v1300_v35 }
 0x408   :  { %1006 = vmatprep.subr.bf16.mxu0 %v1174_v16 }
 0x40b   :  { %1007 = vmatpush3.bf16.msra.mxu0 %v1306_v36 }
 0x40c   :  { %1032 = vmatprep.subr.bf16.mxu0 %v1174_v16 }
 0x4ae   :  { %v473_v7 = vpop.f32.mrf.mxu0 }
 0x4af   :  { %v479_v8 = vadd.f32 %v473_v7, %v226_v51 }
 0x4b0   :  { %v970_v9 = vpop.f32.mrf.mxu0 }
 0x4b1   :  { %1095 = vtanh.f32 %v479_v8 }
 0x4b2   :  { %v476_v10 = vpop.f32.mrf.mxu0 }
 0x4b4   :  { %v971_v11 = vpop.f32.mrf.mxu0 }
 0x4be   :  { %v1096_v12 = vpop.eup %1095 }
 0x4bf   :  { %v482_v15 = vpack.c.bf16 %v1096_v12, %v1096_v12  ;;  %v481_v18 = vadd.f32 %v1096_v12, %v437_v5 }
 0x4c1   :  { %989 = vmatmul.mubr.bf16.vlgmr.msra.gmra.mxu1 %v482_v15 }
 0x4c2   :  { %1013 = vmatpush3.bf16.msra.mxu1 %v1250_v13  ;;  %1028 = vmatprep.mubr.msk.bf16.mxu1 %vm1176_vm12, %v1174_v16 }
 0x4c3   :  { %1014 = vmatprep.subr.bf16.mxu1 %v1174_v16 }
 0x4c6   :  { %1015 = vmatpush3.bf16.msra.mxu1 %v1252_v14 }
 0x4c7   :  { %1016 = vmatprep.subr.bf16.mxu1 %v1174_v16 }
 0x4ca   :  { %1017 = vmatpush3.bf16.msra.mxu1 %v1260_v17 }
 0x4cb   :  { %1018 = vmatprep.subr.bf16.mxu1 %v1174_v16 }
 0x4ce   :  { %1019 = vmatpush3.bf16.msra.mxu1 %v1282_v32 }
 0x4cf   :  { %1020 = vmatprep.subr.bf16.mxu1 %v1174_v16 }
 0x4d2   :  { %1021 = vmatpush3.bf16.msra.mxu1 %v1288_v33 }
 0x4d3   :  { %1022 = vmatprep.subr.bf16.mxu1 %v1174_v16 }
 0x4d6   :  { %1023 = vmatpush3.bf16.msra.mxu1 %v1294_v34 }
 0x4d7   :  { %1024 = vmatprep.subr.bf16.mxu1 %v1174_v16 }
 0x4da   :  { %1025 = vmatpush3.bf16.msra.mxu1 %v1300_v35  ;;  %v1082_v35 = vld [vmem:[#allocation5 + $0x20] sm:$0xff]  }
 0x4db   :  { %1026 = vmatprep.subr.bf16.mxu1 %v1174_v16 }
 0x4de   :  { %1027 = vmatpush3.bf16.msra.mxu1 %v1306_v36  ;;  %v1083_v36 = vld [vmem:[#allocation5 + $0x18] sm:$0xff]  }
 0x581   :  { %v517_v13 = vpop.f32.mrf.mxu1 }
 0x582   :  { %v523_v14 = vadd.f32 %v517_v13, %v1356_v53 }
 0x583   :  { %v990_v17 = vpop.f32.mrf.mxu1 }
 0x584   :  { %1097 = vtanh.f32 %v523_v14 }
 0x585   :  { %v520_v19 = vpop.f32.mrf.mxu1 }
 0x587   :  { %v991_v20 = vpop.f32.mrf.mxu1 }
 0x591   :  { %v1098_v21 = vpop.eup %1097 }
 0x592   :  { %v526_v22 = vpack.c.bf16 %v1098_v21, %v1098_v21  ;;  %v525_v23 = vadd.f32 %v1098_v21, %v481_v18 }
 0x594   :  { %1009 = vmatmul.mubr.bf16.vlgmr.msra.gmra.mxu0 %v526_v22 }
 0x595   :  { %1048 = vmatprep.mubr.msk.bf16.mxu0 %vm1176_vm12, %v1174_v16  ;;  %1033 = vmatpush3.bf16.msra.mxu0 %v1079_v24 }
 0x596   :  { %1034 = vmatprep.subr.bf16.mxu0 %v1174_v16 }
 0x599   :  { %1035 = vmatpush3.bf16.msra.mxu0 %v1080_v25 }
 0x59a   :  { %1036 = vmatprep.subr.bf16.mxu0 %v1174_v16 }
 0x59d   :  { %1037 = vmatpush3.bf16.msra.mxu0 %v1081_v26 }
 0x59e   :  { %1038 = vmatprep.subr.bf16.mxu0 %v1174_v16 }
 0x5a1   :  { %1039 = vmatpush3.bf16.msra.mxu0 %v1082_v35 }
 0x5a2   :  { %1040 = vmatprep.subr.bf16.mxu0 %v1174_v16 }
 0x5a5   :  { %1041 = vmatpush3.bf16.msra.mxu0 %v1083_v36 }
 0x5a6   :  { %1042 = vmatprep.subr.bf16.mxu0 %v1174_v16 }
 0x5a9   :  { %1043 = vmatpush3.bf16.msra.mxu0 %v1084_v37 }
 0x5aa   :  { %1044 = vmatprep.subr.bf16.mxu0 %v1174_v16 }
 0x5ad   :  { %1045 = vmatpush3.bf16.msra.mxu0 %v1085_v38 }
 0x5ae   :  { %1046 = vmatprep.subr.bf16.mxu0 %v1174_v16 }
 0x5b1   :  { %1047 = vmatpush3.bf16.msra.mxu0 %v1086_v39 }
 0x654   :  { %v561_v27 = vpop.f32.mrf.mxu0 }
 0x655   :  { %v567_v28 = vadd.f32 %v1352_v50, %v561_v27 }
 0x656   :  { %v1010_v29 = vpop.f32.mrf.mxu0 }
 0x657   :  { %1099 = vtanh.f32 %v567_v28 }
 0x658   :  { %v564_v30 = vpop.f32.mrf.mxu0 }
 0x65a   :  { %v1011_v31 = vpop.f32.mrf.mxu0 }
 0x664   :  { %v1100_v32 = vpop.eup %1099 }
 0x665   :  { %v570_v33 = vpack.c.bf16 %v1100_v32, %v1100_v32  ;;  %v569_v34 = vadd.f32 %v1100_v32, %v525_v23 }
 0x667   :  { %1029 = vmatmul.mubr.bf16.vlgmr.msra.gmra.mxu1 %v570_v33 }
 0x727   :  { %v605_v40 = vpop.f32.mrf.mxu1 }
 0x728   :  { %v611_v41 = vadd.f32 %v1354_v52, %v605_v40 }
 0x729   :  { %v1030_v42 = vpop.f32.mrf.mxu1 }
 0x72a   :  { %1101 = vtanh.f32 %v611_v41 }
 0x72b   :  { %v608_v43 = vpop.f32.mrf.mxu1 }
 0x72d   :  { %v1031_v44 = vpop.f32.mrf.mxu1 }
 0x737   :  { %v1102_v45 = vpop.eup %1101 }
 0x738   :  { %v613_v46 = vadd.f32 %v1102_v45, %v569_v34 }
 0x73a   :  { %v614_v47 = vpack.c.bf16 %v613_v46, %v613_v46 }
 0x73c   :  { %1049 = vmatmul.mubr.bf16.vlgmr.msra.gmra.mxu0 %v614_v47 }
 0x7fc   :  { %v720_v49 = vpop.f32.mrf.mxu0 }
 0x7fd   :  { %v721_v16 = vadd.f32 %v775_v48, %v720_v49 }
 0x7fe   :  { %v1050_v50 = vpop.f32.mrf.mxu0 }
 0x7ff   :  { %726 = vst [vmem:[#allocation7] sm:$0xff] %v721_v16 }
 0x800   :  { %v723_v51 = vpop.f32.mrf.mxu0 }
 0x801   :  { %1154 = shalt.err (!%p1151_p0)
}
 0x802   :  { %736 = dma.vmem_to_hbm [thread:$0]  %s734_s3, 128, %s1434_s5, [#allocation4]   ;;  %v1051_v52 = vpop.f32.mrf.mxu0 }
 0x803   :  { %1167 = dma.done.wait [#allocation4], 128  }
 0x804   :  { %1168 = vsyncadd [#allocation4], 4294967168 }
 0x805   :  { %740 = vsyncpa [#allocation3], 1 }
 0x806   :  { %741 = vsyncpa [#allocation6], 1 }
 0x807   :  { %742 = vsyncpa [#allocation4], 1 }

</bundles_post_ra>
